<compile_context>
chip_gen: v5e
topology: v5e:2x2
jax: 0.10.0
libtpu: 0.0.40
codegen_flags: <defaults>
</compile_context>

<pallas_src>
import functools

import jax
import jax.numpy as jnp
from jax import lax
from jax.experimental import pallas as pl
from jax.experimental.pallas import tpu as pltpu


def _corblock_z_kernel(x_ref, wa_ref, wb_ref, o_ref, *,
                       Bt, Hout, BLK2, LC, WoCo, Cout, POUT):
    """One batch tile per grid step.

    x_ref:  (Bt, Hout+1, 2*BLK) bf16   row-pair-packed, zero-padded input (+ bias lane = 1.0)
    wa_ref: (2*BLK, 2*LC)       bf16   banded weights for xp rows {2i, 2i+1}
    wb_ref: (2*BLK, 2*LC)       bf16   banded weights for xp rows {2i+2, 2i+3}
    o_ref:  (Bt, Hout, POUT)    f32    pooled rows (lanes >= Wout*Cout are zero pad)
    """
    # ---- Conv 3x3 / s1 / p1 : two MXU matmuls over row pairs (bias folded in) ----
    a = x_ref[:, 0:Hout, :].reshape(Bt * Hout, BLK2)          # xp rows 2i, 2i+1
    b = x_ref[:, 1:Hout + 1, :].reshape(Bt * Hout, BLK2)      # xp rows 2i+2, 2i+3
    yp = jnp.dot(a, wa_ref[...], preferred_element_type=jnp.float32)
    yp = yp + jnp.dot(b, wb_ref[...], preferred_element_type=jnp.float32)
    yp = jnp.maximum(yp, 0.0)                                  # ReLU (f32)

    # yp lanes: [0:LC) = conv row 2i, [LC:2LC) = conv row 2i+1; inside each half the column
    # order is (col-parity, j, c) with w = 2j + parity.

    # ---- MaxPool rows (window 3, stride 2, pad 1): even, odd, and previous pair's odd row ----
    ev = yp[:, 0:LC].reshape(Bt, Hout, LC)
    od = yp[:, LC:2 * LC].reshape(Bt, Hout, LC)
    od_up = jnp.concatenate(
        [jnp.zeros((Bt, 1, LC), jnp.float32), od[:, :Hout - 1, :]], axis=1)
    rm = jnp.maximum(jnp.maximum(ev, od), od_up)               # (Bt, Hout, LC)

    # ---- MaxPool cols: even cols, odd cols, and previous odd col (shift by Cout lanes) ----
    ec = rm[:, :, 0:WoCo]
    oc = rm[:, :, WoCo:2 * WoCo]
    oc_left = jnp.concatenate(
        [jnp.zeros((Bt, Hout, Cout), jnp.float32), oc[:, :, :WoCo - Cout]], axis=-1)
    pooled = jnp.maximum(jnp.maximum(ec, oc), oc_left)         # (Bt, Hout, Wout*Cout)

    if POUT > WoCo:   # lane-dense store: pad up to 128-lane multiple (wrapper slices it off)
        pooled = jnp.concatenate(
            [pooled, jnp.zeros((Bt, Hout, POUT - WoCo), jnp.float32)], axis=-1)
    o_ref[...] = pooled.astype(o_ref.dtype)


def _pick_batch_tile(B, Hout, target_rows=256):
    """Largest divisor of B with Bt*Hout <= target_rows (fills the MXU M axis)."""
    bt = 1
    for d in range(1, B + 1):
        if B % d == 0 and d * Hout <= target_rows:
            bt = d
    return bt


def corblock_z_forward(x_nchw, w_oihw, bias):
    """Forward of CORblock_Z. x_nchw: (B, Cin, H, W); returns (B, Cout, H//2, W//2)."""
    B, Cin, H, W = x_nchw.shape
    Cout = w_oihw.shape[0]
    assert w_oihw.shape == (Cout, Cin, 3, 3)
    assert H % 2 == 0 and W % 2 == 0
    Hout, Wout = H // 2, W // 2

    f32, bf16 = jnp.float32, jnp.bfloat16
    WC = W * Cin
    BLK = ((WC + 1 + 127) // 128) * 128     # lane-aligned row slab; lane WC carries the bias "1"
    LC = W * Cout                           # one conv row's worth of output lanes
    WoCo = Wout * Cout
    POUT = ((WoCo + 127) // 128) * 128
    BLK2, LC2 = 2 * BLK, 2 * LC

    # ---------- input: NHWC row slabs, zero row/lane padding, bias lane, row-pair packing ----------
    x_rows = jnp.transpose(x_nchw, (0, 2, 3, 1)).reshape(B, H, WC).astype(f32)
    xp = jnp.zeros((B, H + 2, BLK), f32)
    xp = xp.at[:, 1:H + 1, :WC].set(x_rows)
    xp = xp.at[:, 1:H + 1, WC].set(1.0)                 # constant-one lane -> bias via the matmul
    xq = xp.reshape(B, Hout + 1, BLK2).astype(bf16)     # pack xp rows (2g, 2g+1) into lanes

    # ---------- banded, pair-packed conv weights (3x3 taps + bias folded in) ----------
    wk = jnp.transpose(w_oihw, (2, 3, 1, 0)).astype(f32)   # (ky, kx, Cin, Cout)
    k_idx = jnp.arange(BLK)
    wu = k_idx // Cin                                       # input column
    ci = k_idx % Cin
    m_idx = jnp.arange(LC)                                  # output column order: (parity, j, c)
    p_c = m_idx // WoCo
    j_o = (m_idx % WoCo) // Cout
    co = m_idx % Cout
    w_out = 2 * j_o + p_c

    def tap(ky):
        kx = wu[:, None] - w_out[None, :] + 1
        valid = (kx >= 0) & (kx <= 2) & (k_idx[:, None] < WC)
        wk_ky = wk[ky]
        return jnp.where(valid, wk_ky[jnp.clip(kx, 0, 2), ci[:, None], co[None, :]], 0.0)

    t0, t1, t2 = tap(0), tap(1), tap(2)
    zeros_blk = jnp.zeros((BLK, LC), f32)
    bias_half = bias.astype(f32)[co]                        # (LC,), follows the (parity,j,c) order

    # WpA: xp rows 2i (r=0) and 2i+1 (r=1); WpB: xp rows 2i+2 (r=2) and 2i+3 (r=3).
    # Columns: [even conv row | odd conv row].
    wa = jnp.concatenate([jnp.concatenate([t0, zeros_blk], axis=1),
                          jnp.concatenate([t1, t0], axis=1)], axis=0)       # (2BLK, 2LC)
    wb = jnp.concatenate([jnp.concatenate([t2, t1], axis=1),
                          jnp.concatenate([zeros_blk, t2], axis=1)], axis=0)
    wa = wa.at[BLK + WC, :LC].set(bias_half)    # bias for even conv rows (center tap, r=1)
    wb = wb.at[WC, LC:].set(bias_half)          # bias for odd conv rows  (center tap, r=2)
    wa = wa.astype(bf16)
    wb = wb.astype(bf16)

    Bt = _pick_batch_tile(B, Hout)
    kernel = functools.partial(_corblock_z_kernel, Bt=Bt, Hout=Hout, BLK2=BLK2,
                               LC=LC, WoCo=WoCo, Cout=Cout, POUT=POUT)

    out = pl.pallas_call(
        kernel,
        out_shape=jax.ShapeDtypeStruct((B, Hout, POUT), f32),
        grid=(B // Bt,),
        in_specs=[
            pl.BlockSpec((Bt, Hout + 1, BLK2), lambda n: (n, 0, 0)),
            # Grid-invariant weights; at large W*Cout these should be LC-tiled / single-buffered.
            pl.BlockSpec((BLK2, LC2), lambda n: (0, 0)),
            pl.BlockSpec((BLK2, LC2), lambda n: (0, 0)),
        ],
        out_specs=pl.BlockSpec((Bt, Hout, POUT), lambda n: (n, 0, 0)),
        compiler_params=pltpu.CompilerParams(dimension_semantics=("parallel",)),
    )(xq, wa, wb)

    # Drop the lane padding and restore PyTorch's NCHW convention.
    out = out[..., :WoCo].reshape(B, Hout, Wout, Cout)
    return jnp.transpose(out, (0, 3, 1, 2))


def _reference(x_nchw, w_oihw, bias):
    """Pure-JAX reference matching nn.Conv2d / ReLU / nn.MaxPool2d semantics."""
    y = lax.conv_general_dilated(
        x_nchw, w_oihw, window_strides=(1, 1), padding=((1, 1), (1, 1)),
        dimension_numbers=("NCHW", "OIHW", "NCHW"))
    y = y + bias.reshape(1, -1, 1, 1)
    y = jnp.maximum(y, 0.0)
    y = lax.reduce_window(
        y, -jnp.inf, lax.max,
        window_dimensions=(1, 1, 3, 3), window_strides=(1, 1, 2, 2),
        padding=((0, 0), (0, 0), (1, 1), (1, 1)))
    return y


if __name__ == "__main__":
    # CORblock_Z(in_channels=4, out_channels=8, kernel_size=3, stride=1)
    B, Cin, Cout, H, W = 2, 4, 8, 16, 16
    key = jax.random.PRNGKey(0)
    k_x, k_w, k_b = jax.random.split(key, 3)

    x = jax.random.normal(k_x, (B, Cin, H, W), jnp.float32)
    conv_w = jax.random.normal(k_w, (Cout, Cin, 3, 3), jnp.float32) * 0.1
    conv_b = jax.random.normal(k_b, (Cout,), jnp.float32) * 0.1

    # The kernel feeds the MXU with bf16 operands; pre-round the test inputs to bf16 values so
    # the f32 reference sees exactly the same operands (the comparison stays tight).
    x = x.astype(jnp.bfloat16).astype(jnp.float32)
    conv_w = conv_w.astype(jnp.bfloat16).astype(jnp.float32)
    conv_b = conv_b.astype(jnp.bfloat16).astype(jnp.float32)

    out = corblock_z_forward(x, conv_w, conv_b)
    out = jax.block_until_ready(out)

    ref = _reference(x, conv_w, conv_b)
    assert out.shape == ref.shape == (B, Cout, H // 2, W // 2), (out.shape, ref.shape)
    max_err = float(jnp.max(jnp.abs(out - ref)))
    assert jnp.allclose(out, ref, atol=2e-3, rtol=2e-3), f"max abs err = {max_err}"

    print("KERNEL_OK")
</pallas_src>

<mosaic_0001>
module attributes {stable_mosaic.version = 11 : i64} {
  func.func @_corblock_z_kernel(%arg0: i32, %arg1: memref<2x9x256xbf16, #tpu.memory_space<vmem>>, %arg2: memref<256x256xbf16, #tpu.memory_space<vmem>>, %arg3: memref<256x256xbf16, #tpu.memory_space<vmem>>, %arg4: memref<2x8x128xf32, #tpu.memory_space<vmem>>) attributes {dimension_semantics = [#tpu.dimension_semantics<parallel>], iteration_bounds = array<i64: 1>, scalar_prefetch = 0 : i64, scratch_operands = 0 : i64, tpu.core_type = #tpu.core_type<tc>, window_params = [{transform_indices = @transform_0, window_bounds = array<i64: 2, 9, 256>}, {pipeline_mode = #tpu.pipeline_mode<synchronous>, transform_indices = @transform_1, window_bounds = array<i64: 256, 256>}, {pipeline_mode = #tpu.pipeline_mode<synchronous>, transform_indices = @transform_2, window_bounds = array<i64: 256, 256>}, {transform_indices = @transform_3, window_bounds = array<i64: 2, 8, 128>}]} {
    %c0 = arith.constant 0 : index
    %c0_0 = arith.constant 0 : index
    %c0_1 = arith.constant 0 : index
    %0 = vector.load %arg1[%c0, %c0_0, %c0_1] : memref<2x9x256xbf16, #tpu.memory_space<vmem>>, vector<2x8x256xbf16>
    %1 = vector.shape_cast %0 : vector<2x8x256xbf16> to vector<16x256xbf16>
    %c0_2 = arith.constant 0 : index
    %c1 = arith.constant 1 : index
    %c0_3 = arith.constant 0 : index
    %2 = vector.load %arg1[%c0_2, %c1, %c0_3] : memref<2x9x256xbf16, #tpu.memory_space<vmem>>, vector<2x8x256xbf16>
    %3 = vector.shape_cast %2 : vector<2x8x256xbf16> to vector<16x256xbf16>
    %c0_4 = arith.constant 0 : index
    %c0_5 = arith.constant 0 : index
    %4 = vector.load %arg2[%c0_4, %c0_5] : memref<256x256xbf16, #tpu.memory_space<vmem>>, vector<256x256xbf16>
    %cst = arith.constant dense<0.000000e+00> : vector<16x256xf32>
    %5 = tpu.matmul %1, %4, %cst {dimension_numbers = #tpu.dot_dimension_numbers<[1], [0], [0], [1], [0, 0, 1, 1], [], []>} : vector<16x256xbf16>, vector<256x256xbf16>, vector<16x256xf32> -> vector<16x256xf32>
    %c0_6 = arith.constant 0 : index
    %c0_7 = arith.constant 0 : index
    %6 = vector.load %arg3[%c0_6, %c0_7] : memref<256x256xbf16, #tpu.memory_space<vmem>>, vector<256x256xbf16>
    %cst_8 = arith.constant dense<0.000000e+00> : vector<16x256xf32>
    %7 = tpu.matmul %3, %6, %cst_8 {dimension_numbers = #tpu.dot_dimension_numbers<[1], [0], [0], [1], [0, 0, 1, 1], [], []>} : vector<16x256xbf16>, vector<256x256xbf16>, vector<16x256xf32> -> vector<16x256xf32>
    %8 = arith.addf %5, %7 : vector<16x256xf32>
    %cst_9 = arith.constant 0.000000e+00 : f32
    %9 = vector.broadcast %cst_9 : f32 to vector<16x256xf32>
    %10 = arith.maximumf %8, %9 : vector<16x256xf32>
    %11 = vector.extract_strided_slice %10 {offsets = [0, 0], sizes = [16, 128], strides = [1, 1]} : vector<16x256xf32> to vector<16x128xf32>
    %12 = vector.shape_cast %11 : vector<16x128xf32> to vector<2x8x128xf32>
    %13 = vector.extract_strided_slice %10 {offsets = [0, 128], sizes = [16, 128], strides = [1, 1]} : vector<16x256xf32> to vector<16x128xf32>
    %14 = vector.shape_cast %13 : vector<16x128xf32> to vector<2x8x128xf32>
    %cst_10 = arith.constant 0.000000e+00 : f32
    %15 = vector.broadcast %cst_10 : f32 to vector<2x1x128xf32>
    %16 = vector.extract_strided_slice %14 {offsets = [0, 0, 0], sizes = [2, 7, 128], strides = [1, 1, 1]} : vector<2x8x128xf32> to vector<2x7x128xf32>
    %17 = tpu.concatenate %15, %16 in 1 : vector<2x1x128xf32>, vector<2x7x128xf32> -> vector<2x8x128xf32>
    %18 = arith.maximumf %12, %14 : vector<2x8x128xf32>
    %19 = arith.maximumf %18, %17 : vector<2x8x128xf32>
    %20 = vector.extract_strided_slice %19 {offsets = [0, 0, 0], sizes = [2, 8, 64], strides = [1, 1, 1]} : vector<2x8x128xf32> to vector<2x8x64xf32>
    %21 = vector.extract_strided_slice %19 {offsets = [0, 0, 64], sizes = [2, 8, 64], strides = [1, 1, 1]} : vector<2x8x128xf32> to vector<2x8x64xf32>
    %cst_11 = arith.constant 0.000000e+00 : f32
    %22 = vector.broadcast %cst_11 : f32 to vector<2x8x8xf32>
    %23 = vector.extract_strided_slice %21 {offsets = [0, 0, 0], sizes = [2, 8, 56], strides = [1, 1, 1]} : vector<2x8x64xf32> to vector<2x8x56xf32>
    %24 = tpu.concatenate %22, %23 in 2 : vector<2x8x8xf32>, vector<2x8x56xf32> -> vector<2x8x64xf32>
    %25 = arith.maximumf %20, %21 : vector<2x8x64xf32>
    %26 = arith.maximumf %25, %24 : vector<2x8x64xf32>
    %cst_12 = arith.constant 0.000000e+00 : f32
    %27 = vector.broadcast %cst_12 : f32 to vector<2x8x64xf32>
    %28 = tpu.concatenate %26, %27 in 2 : vector<2x8x64xf32>, vector<2x8x64xf32> -> vector<2x8x128xf32>
    %c0_13 = arith.constant 0 : index
    %c0_14 = arith.constant 0 : index
    %c0_15 = arith.constant 0 : index
    %29 = vector.load %arg4[%c0_13, %c0_14, %c0_15] : memref<2x8x128xf32, #tpu.memory_space<vmem>>, vector<2x8x128xf32>
    tpu.vector_store %arg4[%c0_13, %c0_14, %c0_15], %28 {strides = array<i32>} : memref<2x8x128xf32, #tpu.memory_space<vmem>>, vector<2x8x128xf32>,
    return
  }
  func.func @transform_0(%arg0: i32) -> (i32, i32, i32) {
    %c0_i32 = arith.constant 0 : i32
    %c0_i32_0 = arith.constant 0 : i32
    %c0_i32_1 = arith.constant 0 : i32
    return %arg0, %c0_i32, %c0_i32_0 : i32, i32, i32
  }
  func.func @transform_1(%arg0: i32) -> (i32, i32) {
    %c0_i32 = arith.constant 0 : i32
    %c0_i32_0 = arith.constant 0 : i32
    %c0_i32_1 = arith.constant 0 : i32
    return %c0_i32, %c0_i32_0 : i32, i32
  }
  func.func @transform_2(%arg0: i32) -> (i32, i32) {
    %c0_i32 = arith.constant 0 : i32
    %c0_i32_0 = arith.constant 0 : i32
    %c0_i32_1 = arith.constant 0 : i32
    return %c0_i32, %c0_i32_0 : i32, i32
  }
  func.func @transform_3(%arg0: i32) -> (i32, i32, i32) {
    %c0_i32 = arith.constant 0 : i32
    %c0_i32_0 = arith.constant 0 : i32
    %c0_i32_1 = arith.constant 0 : i32
    return %arg0, %c0_i32, %c0_i32_0 : i32, i32, i32
  }
}

</mosaic_0001>

<bundles_post_ra>
// kernel: tpu_custom_call.1
= control target key start
LH: loop header
LB: loop body
LE: loop exit
PB: predicated region body
PF: predicated region fallthrough
CT: control target
= control target key end

     0   :  { %8 = vsyncpa [#allocation3], 0  ;;  %s1155_s0 = inlined_call_operand.vmem [shape: bf16[2,9,256], index: 0, kind: input, shape index: {}]   ;;  %s1156_s1 = inlined_call_operand.hbm [shape: bf16[256,256], index: 1, kind: input, shape index: {}]   ;;  %s1157_s2 = inlined_call_operand.hbm [shape: bf16[256,256], index: 2, kind: input, shape index: {}]   ;;  %s1158_s3 = inlined_call_operand.hbm [shape: f32[2,8,128], index: 3, kind: output, shape index: {}]  }
   0x1   :  { %9 = vsyncpa [#allocation6], 0 }
   0x2   :  { %10 = vsyncpa [#allocation4], 0  ;;  %s17_s14 = sshll.u32 %s1156_s1, 4  ;;  %s1074_s15 = smov [#allocation2]   ;;  %s18_s14 = int_to_ptr.hbm [resolvable:$true] %s17_s14 }
   0x3   :  { %s19_s16 = sshll.u32 %s1074_s15, 4  ;;  %s30_s19 = sshll.u32 %s1157_s2, 4  ;;  %s20_s16 = int_to_ptr.vmem [resolvable:$true] %s19_s16  ;;  %s31_s19 = int_to_ptr.hbm [resolvable:$true] %s30_s19 }
   0x4   :  { %s1075_s20 = smov 128   ;;  %s1076_s21 = smov 8  }
   0x5   :  { %25 = dma.hbm_to_vmem [thread:$0]  %s18_s14, 4096, %s20_s16, [#allocation3], %s1075_s20, %s1075_s20, %s1076_s21  }
   0x6   :  { %s1077_s22 = smov [#allocation5]  }
   0x7   :  { %s32_s23 = sshll.u32 %s1077_s22, 4  ;;  %s33_s23 = int_to_ptr.vmem [resolvable:$true] %s32_s23 }
   0x8   :  { %38 = dma.hbm_to_vmem [thread:$0]  %s31_s19, 4096, %s33_s23, [#allocation6], %s1075_s20, %s1075_s20, %s1076_s21  }
   0x9   :  { %1068 = dma.done.wait [#allocation3], 4096  }
   0xa   :  { %1069 = vsyncadd [#allocation3], 4294963200 }
   0xb   :  { %1070 = dma.done.wait [#allocation6], 4096  }
   0xc   :  { %1071 = vsyncadd [#allocation6], 4294963200  ;;  %v717_v0 = vld [vmem:[#allocation5 + $0x70] sm:$0xf]  ;;  %v972_v1 = vld [vmem:[#allocation5 + $0x74] sm:$0xf0] }
   0xd   :  { %v971_v2 = vld [vmem:[#allocation5 + $0x74] sm:$0xf]  ;;  %v718_v3 = vor.u32 %v972_v1, %v717_v0  ;;  %v719_v4 = vld [vmem:[#allocation5 + $0x78] sm:$0xf0]  ;;  %v781_v9 = vld [vmem:[#allocation5 + $0xf0] sm:$0xf] }
   0xe   :  { %v987_v5 = vld [vmem:[#allocation5 + $0xf4] sm:$0xf]  ;;  %v783_v6 = vld [vmem:[#allocation5 + $0xf8] sm:$0xf0]  ;;  %v722_v7 = vor.u32 %v971_v2, %v719_v4  ;;  %v988_v10 = vld [vmem:[#allocation5 + $0xf4] sm:$0xf0] }
   0xf   :  { %v786_v8 = vor.u32 %v987_v5, %v783_v6  ;;  %v709_v11 = vld [vmem:[#allocation5 + $0x60] sm:$0xf]  ;;  %314 = vmatpush.bf16.msra.mxu0 %v718_v3  ;;  %v782_v12 = vor.u32 %v988_v10, %v781_v9  ;;  %v970_v13 = vld [vmem:[#allocation5 + $0x64] sm:$0xf0]  ;;  %v969_v14 = vld [vmem:[#allocation5 + $0x64] sm:$0xf] }
  0x10   :  { %v711_v15 = vld [vmem:[#allocation5 + $0x68] sm:$0xf0]  ;;  %342 = vmatpush.bf16.msra.mxu2 %v722_v7  ;;  %v710_v16 = vor.u32 %v970_v13, %v709_v11  ;;  %v985_v18 = vld [vmem:[#allocation5 + $0xe4] sm:$0xf]  ;;  %v773_v20 = vld [vmem:[#allocation5 + $0xe0] sm:$0xf] }
  0x11   :  { %356 = vmatpush.bf16.msra.mxu3 %v786_v8  ;;  %v714_v17 = vor.u32 %v969_v14, %v711_v15  ;;  %v775_v19 = vld [vmem:[#allocation5 + $0xe8] sm:$0xf0]  ;;  %328 = vmatpush.bf16.msra.mxu1 %v782_v12  ;;  %v986_v22 = vld [vmem:[#allocation5 + $0xe4] sm:$0xf0]  ;;  %v701_v23 = vld [vmem:[#allocation5 + $0x50] sm:$0xf] }
  0x12   :  { %v778_v21 = vor.u32 %v985_v18, %v775_v19  ;;  %v968_v24 = vld [vmem:[#allocation5 + $0x54] sm:$0xf0]  ;;  %v774_v25 = vor.u32 %v986_v22, %v773_v20  ;;  %v967_v26 = vld [vmem:[#allocation5 + $0x54] sm:$0xf]  ;;  %v703_v27 = vld [vmem:[#allocation5 + $0x58] sm:$0xf0] }
  0x13   :  { %v983_v28 = vld [vmem:[#allocation5 + $0xd4] sm:$0xf]  ;;  %315 = vmatpush.bf16.msra.mxu0 %v710_v16  ;;  %v702_v29 = vor.u32 %v968_v24, %v701_v23  ;;  %v767_v30 = vld [vmem:[#allocation5 + $0xd8] sm:$0xf0]  ;;  %v765_v31 = vld [vmem:[#allocation5 + $0xd0] sm:$0xf]  ;;  %v706_v33 = vor.u32 %v967_v26, %v703_v27 }
  0x14   :  { %v984_v32 = vld [vmem:[#allocation5 + $0xd4] sm:$0xf0]  ;;  %343 = vmatpush.bf16.msra.mxu2 %v714_v17  ;;  %v770_v34 = vor.u32 %v983_v28, %v767_v30  ;;  %v693_v35 = vld [vmem:[#allocation5 + $0x40] sm:$0xf]  ;;  %v966_v36 = vld [vmem:[#allocation5 + $0x44] sm:$0xf0] }
  0x15   :  { %357 = vmatpush.bf16.msra.mxu3 %v778_v21  ;;  %v965_v37 = vld [vmem:[#allocation5 + $0x44] sm:$0xf]  ;;  %329 = vmatpush.bf16.msra.mxu1 %v774_v25  ;;  %v766_v38 = vor.u32 %v984_v32, %v765_v31  ;;  %v695_v39 = vld [vmem:[#allocation5 + $0x48] sm:$0xf0]  ;;  %v757_v42 = vld [vmem:[#allocation5 + $0xc0] sm:$0xf]  ;;  %v694_v44 = vor.u32 %v966_v36, %v693_v35 }
  0x16   :  { %v981_v40 = vld [vmem:[#allocation5 + $0xc4] sm:$0xf]  ;;  %v759_v41 = vld [vmem:[#allocation5 + $0xc8] sm:$0xf0]  ;;  %v982_v43 = vld [vmem:[#allocation5 + $0xc4] sm:$0xf0]  ;;  %v698_v45 = vor.u32 %v965_v37, %v695_v39 }
  0x17   :  { %316 = vmatpush.bf16.msra.mxu0 %v702_v29  ;;  %v762_v46 = vor.u32 %v981_v40, %v759_v41  ;;  %v685_v47 = vld [vmem:[#allocation5 + $0x30] sm:$0xf]  ;;  %v964_v48 = vld [vmem:[#allocation5 + $0x34] sm:$0xf0]  ;;  %v963_v49 = vld [vmem:[#allocation5 + $0x34] sm:$0xf]  ;;  %v758_v50 = vor.u32 %v982_v43, %v757_v42 }
  0x18   :  { %344 = vmatpush.bf16.msra.mxu2 %v706_v33  ;;  %v687_v51 = vld [vmem:[#allocation5 + $0x38] sm:$0xf0]  ;;  %v979_v52 = vld [vmem:[#allocation5 + $0xb4] sm:$0xf]  ;;  %v749_v54 = vld [vmem:[#allocation5 + $0xb0] sm:$0xf]  ;;  %v686_v56 = vor.u32 %v964_v48, %v685_v47 }
  0x19   :  { %358 = vmatpush.bf16.msra.mxu3 %v770_v34  ;;  %330 = vmatpush.bf16.msra.mxu1 %v766_v38  ;;  %v751_v53 = vld [vmem:[#allocation5 + $0xb8] sm:$0xf0]  ;;  %v980_v55 = vld [vmem:[#allocation5 + $0xb4] sm:$0xf0]  ;;  %v690_v57 = vor.u32 %v963_v49, %v687_v51  ;;  %v677_v59 = vld [vmem:[#allocation5 + $0x20] sm:$0xf] }
  0x1a   :  { %v754_v58 = vor.u32 %v979_v52, %v751_v53  ;;  %v962_v60 = vld [vmem:[#allocation5 + $0x24] sm:$0xf0]  ;;  %v961_v61 = vld [vmem:[#allocation5 + $0x24] sm:$0xf]  ;;  %v750_v62 = vor.u32 %v980_v55, %v749_v54  ;;  %v679_v63 = vld [vmem:[#allocation5 + $0x28] sm:$0xf0] }
  0x1b   :  { %317 = vmatpush.bf16.msra.mxu0 %v694_v44  ;;  %v977_v0 = vld [vmem:[#allocation5 + $0xa4] sm:$0xf]  ;;  %v743_v1 = vld [vmem:[#allocation5 + $0xa8] sm:$0xf0]  ;;  %v741_v2 = vld [vmem:[#allocation5 + $0xa0] sm:$0xf]  ;;  %v678_v5 = vor.u32 %v962_v60, %v677_v59  ;;  %v682_v9 = vor.u32 %v961_v61, %v679_v63 }
  0x1c   :  { %345 = vmatpush.bf16.msra.mxu2 %v698_v45  ;;  %v978_v3 = vld [vmem:[#allocation5 + $0xa4] sm:$0xf0]  ;;  %v669_v4 = vld [vmem:[#allocation5 + $0x10] sm:$0xf]  ;;  %v960_v6 = vld [vmem:[#allocation5 + $0x14] sm:$0xf0]  ;;  %v746_v10 = vor.u32 %v977_v0, %v743_v1 }
  0x1d   :  { %359 = vmatpush.bf16.msra.mxu3 %v762_v46  ;;  %331 = vmatpush.bf16.msra.mxu1 %v758_v50  ;;  %v959_v7 = vld [vmem:[#allocation5 + $0x14] sm:$0xf]  ;;  %v671_v8 = vld [vmem:[#allocation5 + $0x18] sm:$0xf0]  ;;  %v733_v13 = vld [vmem:[#allocation5 + $0x90] sm:$0xf]  ;;  %v742_v14 = vor.u32 %v978_v3, %v741_v2  ;;  %v670_v21 = vor.u32 %v960_v6, %v669_v4 }
  0x1e   :  { %v975_v11 = vld [vmem:[#allocation5 + $0x94] sm:$0xf]  ;;  %v735_v12 = vld [vmem:[#allocation5 + $0x98] sm:$0xf0]  ;;  %v976_v15 = vld [vmem:[#allocation5 + $0x94] sm:$0xf0]  ;;  %v674_v25 = vor.u32 %v959_v7, %v671_v8 }
  0x1f   :  { %318 = vmatpush.bf16.msra.mxu0 %v686_v56  ;;  %v661_v16 = vld [vmem:[#allocation5] sm:$0xf]  ;;  %v958_v17 = vld [vmem:[#allocation5 + $0x4] sm:$0xf0]  ;;  %v957_v18 = vld [vmem:[#allocation5 + $0x4] sm:$0xf]  ;;  %v738_v26 = vor.u32 %v975_v11, %v735_v12  ;;  %v734_v30 = vor.u32 %v976_v15, %v733_v13 }
  0x20   :  { %346 = vmatpush.bf16.msra.mxu2 %v690_v57  ;;  %v663_v19 = vld [vmem:[#allocation5 + $0x8] sm:$0xf0]  ;;  %v973_v20 = vld [vmem:[#allocation5 + $0x84] sm:$0xf]  ;;  %v725_v23 = vld [vmem:[#allocation5 + $0x80] sm:$0xf]  ;;  %v662_v34 = vor.u32 %v958_v17, %v661_v16 }
  0x21   :  { %360 = vmatpush.bf16.msra.mxu3 %v754_v58  ;;  %332 = vmatpush.bf16.msra.mxu1 %v750_v62  ;;  %v727_v22 = vld [vmem:[#allocation5 + $0x88] sm:$0xf0]  ;;  %v974_v24 = vld [vmem:[#allocation5 + $0x84] sm:$0xf0]  ;;  %v853_v27 = vld [vmem:[#allocation2 + $0x70] sm:$0xf]  ;;  %v666_v38 = vor.u32 %v957_v18, %v663_v19 }
  0x22   :  { %v940_v28 = vld [vmem:[#allocation2 + $0x74] sm:$0xf0]  ;;  %v939_v29 = vld [vmem:[#allocation2 + $0x74] sm:$0xf]  ;;  %v855_v31 = vld [vmem:[#allocation2 + $0x78] sm:$0xf0]  ;;  %v730_v39 = vor.u32 %v973_v20, %v727_v22  ;;  %v726_v40 = vor.u32 %v974_v24, %v725_v23 }
  0x23   :  { %319 = vmatpush.bf16.msra.mxu0 %v678_v5  ;;  %v955_v32 = vld [vmem:[#allocation2 + $0xf4] sm:$0xf]  ;;  %v919_v33 = vld [vmem:[#allocation2 + $0xf8] sm:$0xf0]  ;;  %v917_v35 = vld [vmem:[#allocation2 + $0xf0] sm:$0xf]  ;;  %v854_v45 = vor.u32 %v940_v28, %v853_v27  ;;  %v858_v46 = vor.u32 %v939_v29, %v855_v31 }
  0x24   :  { %347 = vmatpush.bf16.msra.mxu2 %v682_v9  ;;  %v956_v36 = vld [vmem:[#allocation2 + $0xf4] sm:$0xf0]  ;;  %v47_v37 = vld [vmem:[%s1155_s0] sm:$0xff]  ;;  %v48_v41 = vld [vmem:[%s1155_s0 + $0x10] sm:$0xff]  ;;  %v922_v57 = vor.u32 %v955_v32, %v919_v33  ;;  %vm51_vm0 = vsmask.f32 3328 }
  0x25   :  { %361 = vmatpush.bf16.msra.mxu3 %v746_v10  ;;  %333 = vmatpush.bf16.msra.mxu1 %v742_v14  ;;  %v49_v42 = vld [vmem:[%s1155_s0 + $0x8] sm:$0x11]  ;;  %v50_v43 = vld [vmem:[%s1155_s0 + $0x18] sm:$0x11]  ;;  %v55_v44 = vshrl.u32 %v47_v37, 16  ;;  %v58_v49 = vshll.u32 %v47_v37, 16  ;;  %v918_v59 = vor.u32 %v956_v36, %v917_v35 }
  0x26   :  { %v845_v47 = vld [vmem:[#allocation2 + $0x60] sm:$0xf]  ;;  %v938_v48 = vld [vmem:[#allocation2 + $0x64] sm:$0xf0]  ;;  %v64_v50 = vshll.u32 %v49_v42, 16  ;;  %v69_v54 = vshrl.u32 %v48_v41, 16 }
  0x27   :  { %320 = vmatpush.bf16.msra.mxu0 %v670_v21  ;;  %v937_v51 = vld [vmem:[#allocation2 + $0x64] sm:$0xf]  ;;  %v847_v52 = vld [vmem:[#allocation2 + $0x68] sm:$0xf0]  ;;  %v57_v53 = vrot.slane %v55_v44, 4  ;;  %v72_v55 = vshll.u32 %v48_v41, 16  ;;  %v846_v4 = vor.u32 %v938_v48, %v845_v47 }
  0x28   :  { %348 = vmatpush.bf16.msra.mxu2 %v674_v25  ;;  %v78_v56 = vshll.u32 %v50_v43, 16  ;;  %vm52_vm1 = vsmask.f32 7440  ;;  %v60_v58 = vrot.slane %v58_v49, 5  ;;  %v953_v60 = vld [vmem:[#allocation2 + $0xe4] sm:$0xf]  ;;  %v850_v8 = vor.u32 %v937_v51, %v847_v52 }
  0x29   :  { %362 = vmatpush.bf16.msra.mxu3 %v738_v26  ;;  %334 = vmatpush.bf16.msra.mxu1 %v734_v30  ;;  %v911_v61 = vld [vmem:[#allocation2 + $0xe8] sm:$0xf0]  ;;  %v71_v62 = vrot.slane %v69_v54, 4  ;;  %v74_v63 = vrot.slane %v72_v55, 5  ;;  %v909_v0 = vld [vmem:[#allocation2 + $0xe0] sm:$0xf]  ;;  %vm1127_vm2 = vmor %vm51_vm0, %vm52_vm1 }
  0x2a   :  { %v954_v1 = vld [vmem:[#allocation2 + $0xe4] sm:$0xf0]  ;;  %v61_v2 = vor.u32 %v60_v58, %v57_v53  ;;  %v66_v3 = vrot.slane %v64_v50, 5  ;;  %v80_v7 = vrot.slane %v78_v56, 5  ;;  %v914_v9 = vor.u32 %v953_v60, %v911_v61  ;;  %v837_v11 = vld [vmem:[#allocation2 + $0x50] sm:$0xf] }
  0x2b   :  { %321 = vmatpush.bf16.msra.mxu0 %v662_v34  ;;  %v75_v6 = vor.u32 %v74_v63, %v71_v62  ;;  %v936_v12 = vld [vmem:[#allocation2 + $0x54] sm:$0xf0]  ;;  %v910_v13 = vor.u32 %v954_v1, %v909_v0  ;;  %v935_v15 = vld [vmem:[#allocation2 + $0x54] sm:$0xf]  ;;  %v839_v17 = vld [vmem:[#allocation2 + $0x58] sm:$0xf0] }
  0x2c   :  { %349 = vmatpush.bf16.msra.mxu2 %v666_v38  ;;  %v62_v10 = vrot.slane %v61_v2, 4  ;;  %v951_v18 = vld [vmem:[#allocation2 + $0xd4] sm:$0xf]  ;;  %v903_v19 = vld [vmem:[#allocation2 + $0xd8] sm:$0xf0]  ;;  %v838_v23 = vor.u32 %v936_v12, %v837_v11  ;;  %v842_v30 = vor.u32 %v935_v15, %v839_v17  ;;  %vm606_vm3 = vcmask 1040384  }
  0x2d   :  { %363 = vmatpush.bf16.msra.mxu3 %v730_v39  ;;  %335 = vmatpush.bf16.msra.mxu1 %v726_v40  ;;  %v76_v14 = vrot.slane %v75_v6, 4  ;;  %v901_v24 = vld [vmem:[#allocation2 + $0xd0] sm:$0xf]  ;;  %v952_v25 = vld [vmem:[#allocation2 + $0xd4] sm:$0xf0]  ;;  %v906_v31 = vor.u32 %v951_v18, %v903_v19  ;;  %s1079_s11 = smov 64  }
  0x2e   :  { %v67_v16 = vsel %vm1127_vm2, %v62_v10, %v66_v3  ;;  %v829_v28 = vld [vmem:[#allocation2 + $0x40] sm:$0xf]  ;;  %v934_v29 = vld [vmem:[#allocation2 + $0x44] sm:$0xf0]  ;;  %v933_v32 = vld [vmem:[#allocation2 + $0x44] sm:$0xf]  ;;  %v902_v35 = vor.u32 %v952_v25, %v901_v24 }
  0x2f   :  { %540 = vmatpush.bf16.msrb.mxu0 %v854_v45  ;;  %v81_v20 = vsel %vm1127_vm2, %v76_v14, %v80_v7  ;;  %v146_v21 = vunpack.c.l.b16 %v67_v16  ;;  %v147_v22 = vunpack.c.h.b16 %v67_v16  ;;  %v831_v36 = vld [vmem:[#allocation2 + $0x48] sm:$0xf0]  ;;  %v949_v37 = vld [vmem:[#allocation2 + $0xc4] sm:$0xf]  ;;  %v830_v39 = vor.u32 %v934_v29, %v829_v28  ;;  %v893_v40 = vld [vmem:[#allocation2 + $0xc0] sm:$0xf] }
  0x30   :  { %568 = vmatpush.bf16.msrb.mxu2 %v858_v46  ;;  %v148_v26 = vunpack.c.l.b16 %v81_v20  ;;  %v149_v27 = vunpack.c.h.b16 %v81_v20  ;;  %v895_v38 = vld [vmem:[#allocation2 + $0xc8] sm:$0xf0]  ;;  %v950_v41 = vld [vmem:[#allocation2 + $0xc4] sm:$0xf0]  ;;  %v821_v42 = vld [vmem:[#allocation2 + $0x30] sm:$0xf]  ;;  %v834_v44 = vor.u32 %v933_v32, %v831_v36 }
  0x31   :  { %582 = vmatpush.bf16.msrb.mxu3 %v922_v57  ;;  %554 = vmatpush.bf16.msrb.mxu1 %v918_v59  ;;  %v932_v43 = vld [vmem:[#allocation2 + $0x34] sm:$0xf0]  ;;  %v898_v45 = vor.u32 %v949_v37, %v895_v38  ;;  %v931_v46 = vld [vmem:[#allocation2 + $0x34] sm:$0xf]  ;;  %v894_v47 = vor.u32 %v950_v41, %v893_v40  ;;  %v823_v48 = vld [vmem:[#allocation2 + $0x38] sm:$0xf0] }
  0x32   :  { %v150_v33 = vpack.c.b16 %v148_v26, %v146_v21  ;;  %v151_v34 = vpack.c.b16 %v149_v27, %v147_v22  ;;  %v947_v49 = vld [vmem:[#allocation2 + $0xb4] sm:$0xf]  ;;  %v887_v50 = vld [vmem:[#allocation2 + $0xb8] sm:$0xf0]  ;;  %v822_v51 = vor.u32 %v932_v43, %v821_v42  ;;  %v885_v52 = vld [vmem:[#allocation2 + $0xb0] sm:$0xf]  ;;  %v826_v56 = vor.u32 %v931_v46, %v823_v48 }
  0x33   :  { %541 = vmatpush.bf16.msrb.mxu0 %v846_v4  ;;  %v948_v53 = vld [vmem:[#allocation2 + $0xb4] sm:$0xf0]  ;;  %v813_v54 = vld [vmem:[#allocation2 + $0x20] sm:$0xf]  ;;  %v930_v55 = vld [vmem:[#allocation2 + $0x24] sm:$0xf0]  ;;  %v890_v57 = vor.u32 %v947_v49, %v887_v50 }
  0x34   :  { %569 = vmatpush.bf16.msrb.mxu2 %v850_v8  ;;  %364 = vmatmul.bf16.vlgmr.msra.gmra.mxu3 %v151_v34  ;;  %v929_v58 = vld [vmem:[#allocation2 + $0x24] sm:$0xf]  ;;  %v886_v59 = vor.u32 %v948_v53, %v885_v52  ;;  %v815_v60 = vld [vmem:[#allocation2 + $0x28] sm:$0xf0]  ;;  %v814_v63 = vor.u32 %v930_v55, %v813_v54  ;;  %v877_v0 = vld [vmem:[#allocation2 + $0xa0] sm:$0xf] }
  0x35   :  { %583 = vmatpush.bf16.msrb.mxu3 %v914_v9  ;;  %555 = vmatpush.bf16.msrb.mxu1 %v910_v13  ;;  %v945_v61 = vld [vmem:[#allocation2 + $0xa4] sm:$0xf]  ;;  %v879_v62 = vld [vmem:[#allocation2 + $0xa8] sm:$0xf0]  ;;  %v946_v1 = vld [vmem:[#allocation2 + $0xa4] sm:$0xf0]  ;;  %v818_v4 = vor.u32 %v929_v58, %v815_v60 }
  0x36   :  { %350 = vmatmul.bf16.vlgmr.msra.gmra.mxu2 %v150_v33  ;;  %322 = vmatmul.bf16.vlgmr.msra.gmra.mxu0 %v150_v33  ;;  %v805_v2 = vld [vmem:[#allocation2 + $0x10] sm:$0xf]  ;;  %v928_v3 = vld [vmem:[#allocation2 + $0x14] sm:$0xf0]  ;;  %v882_v5 = vor.u32 %v945_v61, %v879_v62  ;;  %v927_v6 = vld [vmem:[#allocation2 + $0x14] sm:$0xf]  ;;  %v878_v7 = vor.u32 %v946_v1, %v877_v0 }
  0x37   :  { %542 = vmatpush.bf16.msrb.mxu0 %v838_v23  ;;  %336 = vmatmul.bf16.vlgmr.msra.gmra.mxu1 %v151_v34  ;;  %v807_v8 = vld [vmem:[#allocation2 + $0x18] sm:$0xf0]  ;;  %v943_v9 = vld [vmem:[#allocation2 + $0x94] sm:$0xf]  ;;  %v806_v11 = vor.u32 %v928_v3, %v805_v2  ;;  %v869_v12 = vld [vmem:[#allocation2 + $0x90] sm:$0xf] }
  0x38   :  { %570 = vmatpush.bf16.msrb.mxu2 %v842_v30  ;;  %v871_v10 = vld [vmem:[#allocation2 + $0x98] sm:$0xf0]  ;;  %v944_v13 = vld [vmem:[#allocation2 + $0x94] sm:$0xf0]  ;;  %v797_v14 = vld [vmem:[#allocation2] sm:$0xf]  ;;  %v810_v16 = vor.u32 %v927_v6, %v807_v8 }
  0x39   :  { %584 = vmatpush.bf16.msrb.mxu3 %v906_v31  ;;  %556 = vmatpush.bf16.msrb.mxu1 %v902_v35  ;;  %v926_v15 = vld [vmem:[#allocation2 + $0x4] sm:$0xf0]  ;;  %v874_v17 = vor.u32 %v943_v9, %v871_v10  ;;  %v925_v18 = vld [vmem:[#allocation2 + $0x4] sm:$0xf]  ;;  %v799_v19 = vld [vmem:[#allocation2 + $0x8] sm:$0xf0]  ;;  %v870_v20 = vor.u32 %v944_v13, %v869_v12 }
  0x3a   :  { %v941_v21 = vld [vmem:[#allocation2 + $0x84] sm:$0xf]  ;;  %v863_v22 = vld [vmem:[#allocation2 + $0x88] sm:$0xf0]  ;;  %v861_v23 = vld [vmem:[#allocation2 + $0x80] sm:$0xf]  ;;  %v798_v24 = vor.u32 %v926_v15, %v797_v14  ;;  %v802_v28 = vor.u32 %v925_v18, %v799_v19 }
  0x3b   :  { %543 = vmatpush.bf16.msrb.mxu0 %v830_v39  ;;  %v942_v25 = vld [vmem:[#allocation2 + $0x84] sm:$0xf0]  ;;  %v789_v26 = vld [vmem:[%s1155_s0] sm:$0xf]  ;;  %v924_v27 = vld [vmem:[%s1155_s0 + $0xc] sm:$0xf0]  ;;  %v866_v29 = vor.u32 %v941_v21, %v863_v22 }
  0x3c   :  { %571 = vmatpush.bf16.msrb.mxu2 %v834_v44  ;;  %v923_v30 = vld [vmem:[%s1155_s0 + $0x4] sm:$0xf]  ;;  %v791_v31 = vld [vmem:[%s1155_s0 + $0x10] sm:$0xf0]  ;;  %v862_v32 = vor.u32 %v942_v25, %v861_v23  ;;  %v790_v33 = vor.u32 %v924_v27, %v789_v26  ;;  %s1078_s0 = smov 72   ;;  %vm621_vm4 = vcmask 64512  }
  0x3d   :  { %585 = vmatpush.bf16.msrb.mxu3 %v898_v45  ;;  %557 = vmatpush.bf16.msrb.mxu1 %v894_v47  ;;  %v794_v34 = vor.u32 %v923_v30, %v791_v31  ;;  %vm634_vm5 = vcmask 523264   ;;  %s1080_s12 = smov [#allocation7]   ;;  %s645_s16 = sshll.u32 %s1158_s3, 4  ;;  %s646_s16 = int_to_ptr.hbm [resolvable:$true] %s645_s16 }
  0x3e   :  { %s643_s13 = sshll.u32 %s1080_s12, 4  ;;  %s644_s13 = int_to_ptr.vmem [resolvable:$true] %s643_s13 }
  0x3f   :  { %544 = vmatpush.bf16.msrb.mxu0 %v822_v51 }
  0x40   :  { %572 = vmatpush.bf16.msrb.mxu2 %v826_v56 }
  0x41   :  { %586 = vmatpush.bf16.msrb.mxu3 %v890_v57  ;;  %558 = vmatpush.bf16.msrb.mxu1 %v886_v59 }
  0x43   :  { %545 = vmatpush.bf16.msrb.mxu0 %v814_v63 }
  0x44   :  { %573 = vmatpush.bf16.msrb.mxu2 %v818_v4 }
  0x45   :  { %587 = vmatpush.bf16.msrb.mxu3 %v882_v5  ;;  %559 = vmatpush.bf16.msrb.mxu1 %v878_v7 }
  0x47   :  { %546 = vmatpush.bf16.msrb.mxu0 %v806_v11 }
  0x48   :  { %574 = vmatpush.bf16.msrb.mxu2 %v810_v16 }
  0x49   :  { %588 = vmatpush.bf16.msrb.mxu3 %v874_v17  ;;  %560 = vmatpush.bf16.msrb.mxu1 %v870_v20 }
  0x4b   :  { %547 = vmatpush.bf16.msrb.mxu0 %v798_v24 }
  0x4c   :  { %575 = vmatpush.bf16.msrb.mxu2 %v802_v28 }
  0x4d   :  { %589 = vmatpush.bf16.msrb.mxu3 %v866_v29  ;;  %561 = vmatpush.bf16.msrb.mxu1 %v862_v32 }
  0x4e   :  { %548 = vmatmul.bf16.vlgmr.msrb.gmra.mxu0 %v790_v33 }
  0x4f   :  { %576 = vmatmul.bf16.vlgmr.msrb.gmra.mxu2 %v790_v33 }
  0x50   :  { %590 = vmatmul.bf16.vlgmr.msrb.gmra.mxu3 %v794_v34  ;;  %562 = vmatmul.bf16.vlgmr.msrb.gmra.mxu1 %v794_v34 }
  0xb3   :  { %v323_v35 = vpop.f32.mrf.mxu0 }
  0xb4   :  { %v337_v36 = vpop.f32.mrf.mxu1 }
  0xb5   :  { %v338_v44 = vadd.f32 %v337_v36, %v323_v35 }
  0xb7   :  { %v365_v38 = vpop.f32.mrf.mxu3 }
  0xb9   :  { %v351_v37 = vpop.f32.mrf.mxu2 }
  0xba   :  { %v366_v47 = vadd.f32 %v365_v38, %v351_v37 }
  0xbb   :  { %v325_v39 = vpop.f32.mrf.mxu0 }
  0xbc   :  { %v339_v40 = vpop.f32.mrf.mxu1 }
  0xbd   :  { %v340_v53 = vadd.f32 %v339_v40, %v325_v39 }
  0xbf   :  { %v367_v42 = vpop.f32.mrf.mxu3 }
  0xc1   :  { %v353_v41 = vpop.f32.mrf.mxu2 }
  0xc2   :  { %v368_v59 = vadd.f32 %v367_v42, %v353_v41 }
  0xcb   :  { %v549_v43 = vpop.f32.mrf.mxu0 }
  0xcc   :  { %v550_v46 = vadd.f32 %v549_v43, %v338_v44 }
  0xcd   :  { %v563_v45 = vpop.f32.mrf.mxu1 }
  0xce   :  { %v564_v50 = vadd.f32 %v563_v45, %v550_v46 }
  0xd0   :  { %v596_v55 = vmax.f32 %v564_v50, 0.0 }
  0xd2   :  { %v577_v48 = vpop.f32.mrf.mxu2 }
  0xd3   :  { %v591_v49 = vpop.f32.mrf.mxu3  ;;  %v578_v51 = vadd.f32 %v577_v48, %v366_v47  ;;  %v551_v52 = vpop.f32.mrf.mxu0 }
  0xd4   :  { %v552_v57 = vadd.f32 %v551_v52, %v340_v53 }
  0xd5   :  { %v592_v54 = vadd.f32 %v591_v49, %v578_v51  ;;  %v565_v58 = vpop.f32.mrf.mxu1 }
  0xd6   :  { %v566_v63 = vadd.f32 %v565_v58, %v552_v57 }
  0xd7   :  { %v597_v56 = vmax.f32 %v592_v54, 0.0 }
  0xd8   :  { %v598_v5 = vmax.f32 %v566_v63, 0.0 }
  0xd9   :  { %v602_v60 = vrot.slane %v597_v56, 7  ;;  %v609_v61 = vmax.f32 %v596_v55, %v597_v56 }
  0xda   :  { %v579_v62 = vpop.f32.mrf.mxu2 }
  0xdb   :  { %v580_v0 = vadd.f32 %v579_v62, %v368_v59  ;;  %v607_v1 = vsel %vm606_vm3, 0.0, %v602_v60  ;;  %v593_v2 = vpop.f32.mrf.mxu3 }
  0xdc   :  { %v611_v3 = vmax.f32 %v609_v61, %v607_v1 }
  0xdd   :  { %v594_v4 = vadd.f32 %v593_v2, %v580_v0 }
  0xde   :  { %615 = vrot.lane.b32.xlu1 %v611_v3, %s1078_s0  ;;  %624 = vrot.lane.b32.xlu0 %v611_v3, %s1079_s11 }
  0xdf   :  { %v599_v6 = vmax.f32 %v594_v4, 0.0 }
  0xe1   :  { %v603_v7 = vrot.slane %v599_v6, 7  ;;  %v610_v8 = vmax.f32 %v598_v5, %v599_v6 }
  0xe3   :  { %v608_v9 = vsel %vm606_vm3, 0.0, %v603_v7 }
  0xe4   :  { %v612_v10 = vmax.f32 %v610_v8, %v608_v9 }
  0xe6   :  { %617 = vrot.lane.b32.xlu1 %v612_v10, %s1078_s0  ;;  %626 = vrot.lane.b32.xlu0 %v612_v10, %s1079_s11 }
 0x150   :  { %v616_v11 = vpop.permute.xlu1 %615  ;;  %v625_v12 = vpop.permute.xlu0 %624 }
 0x151   :  { %v622_v13 = vsel %vm621_vm4, 0.0, %v616_v11  ;;  %v630_v14 = vmax.f32 %v611_v3, %v625_v12 }
 0x153   :  { %v632_v15 = vmax.f32 %v630_v14, %v622_v13 }
 0x155   :  { %v635_v16 = vsel %vm634_vm5, %v632_v15, 0.0 }
 0x156   :  { %637 = vst [vmem:[#allocation7] sm:$0xff] %v635_v16 }
 0x158   :  { %v618_v17 = vpop.permute.xlu1 %617  ;;  %v627_v18 = vpop.permute.xlu0 %626 }
 0x159   :  { %v623_v19 = vsel %vm621_vm4, 0.0, %v618_v17  ;;  %v631_v20 = vmax.f32 %v612_v10, %v627_v18 }
 0x15b   :  { %v633_v21 = vmax.f32 %v631_v20, %v623_v19 }
 0x15d   :  { %v636_v22 = vsel %vm634_vm5, %v633_v21, 0.0 }
 0x15e   :  { %638 = vst [vmem:[#allocation7 + $0x8] sm:$0xff] %v636_v22 }
 0x15f   :  { %651 = dma.vmem_to_hbm [thread:$0]  %s644_s13, 256, %s646_s16, [#allocation4], %s1075_s20, %s1075_s20, %s1076_s21  }
 0x160   :  { %1072 = dma.done.wait [#allocation4], 256  }
 0x161   :  { %1073 = vsyncadd [#allocation4], 4294967040 }
 0x162   :  { %656 = vsyncpa [#allocation3], 1 }
 0x163   :  { %657 = vsyncpa [#allocation6], 1 }
 0x164   :  { %658 = vsyncpa [#allocation4], 1 }

</bundles_post_ra>
